<compile_context>
chip_gen: v7x
topology: tpu7x:2x2x1
jax: 0.10.0
libtpu: 0.0.40
codegen_flags: <defaults>
</compile_context>

<pallas_src>
import jax
import jax.numpy as jnp
from jax.experimental import pallas as pl
from jax.experimental.pallas import tpu as pltpu


def _round_up(x, m):
    return ((x + m - 1) // m) * m


def _cdiv(a, b):
    return -(-a // b)


def _gate_kernel(x_ref, w1t_ref, b1_ref, w2t_ref, b2_ref, gate_ref):
    # x_ref: (TB, C, L) in the input dtype; weights are f32 (tiny).
    tb = x_ref.shape[0]
    inv_l = 1.0 / x_ref.shape[2]
    x = x_ref[...]

    # Per-(batch, channel) reductions over L.  Max in the native dtype, mean
    # accumulated in f32; no full f32 copy of the tile is materialized.
    x_max = jnp.max(x, axis=2).astype(jnp.float32)              # (TB, C)
    x_avg = jnp.sum(x, axis=2, dtype=jnp.float32) * inv_l       # (TB, C)

    # Fused MLP: one W1 / W2 application over both pooled stats (M = 2*TB).
    p = jnp.concatenate([x_max, x_avg], axis=0)                 # (2*TB, C)
    h = jnp.dot(p, w1t_ref[...], preferred_element_type=jnp.float32) + b1_ref[...]
    h = jnp.maximum(h, 0.0)                                     # (2*TB, H)
    y = jnp.dot(h, w2t_ref[...], preferred_element_type=jnp.float32) + b2_ref[...]
    gate_ref[...] = jax.nn.sigmoid(y[:tb] + y[tb:])             # (TB, C)


def _apply_kernel(x_ref, gate_ref, o_ref):
    # x_ref: (TB, C, L); gate_ref: (TB, C, 1) -> broadcast over the L lanes.
    o_ref[...] = (x_ref[...] * gate_ref[...]).astype(o_ref.dtype)


def cablk_forward(x, w1, b1, w2, b2, *, tb=None):
    """CABLK forward.  x: (B, C, L); w1: (H, C); b1: (H, 1); w2: (C, H); b2: (C, 1)."""
    B, C, L = x.shape
    H = w1.shape[0]

    # ---- choose the batch tile: ~2 MiB of TPU-padded block per grid step ----
    itemsize = jnp.dtype(x.dtype).itemsize
    per_b = _round_up(C, 8) * _round_up(L, 128) * itemsize   # VMEM bytes per batch row
    if tb is None:
        budget = max(8, min(512, (2 * 1024 * 1024) // max(per_b, 1)))
        b_ceil = _round_up(B, 8)
        n_blk = max(1, _cdiv(b_ceil, _round_up(budget, 8)))
        tb = _round_up(_cdiv(b_ceil, n_blk), 8)
    tb = max(8, (tb // 8) * 8)                 # sublane-aligned tile (concat/slice)
    b_pad = _round_up(max(B, tb), tb)
    n_blocks = b_pad // tb

    xp = x if b_pad == B else jnp.pad(x, ((0, b_pad - B), (0, 0), (0, 0)))

    # Tiny, pre-transposed f32 parameters (Conv1d k=1 weights == dense).
    w1t = w1.astype(jnp.float32).T             # (C, H)
    w2t = w2.astype(jnp.float32).T             # (H, C)
    b1r = b1.astype(jnp.float32).reshape(1, H)
    b2r = b2.astype(jnp.float32).reshape(1, C)

    cparams = pltpu.CompilerParams(
        dimension_semantics=("parallel",),
        vmem_limit_bytes=32 * 1024 * 1024,
    )

    # ---- phase 1: per-batch max/mean + fused channel MLP -> sigmoid gate ----
    gate = pl.pallas_call(
        _gate_kernel,
        out_shape=jax.ShapeDtypeStruct((b_pad, C), jnp.float32),
        grid=(n_blocks,),
        in_specs=[
            pl.BlockSpec((tb, C, L), lambda b: (b, 0, 0)),   # x
            pl.BlockSpec((C, H), lambda b: (0, 0)),          # W1^T
            pl.BlockSpec((1, H), lambda b: (0, 0)),          # b1 (row)
            pl.BlockSpec((H, C), lambda b: (0, 0)),          # W2^T
            pl.BlockSpec((1, C), lambda b: (0, 0)),          # b2 (row)
        ],
        out_specs=pl.BlockSpec((tb, C), lambda b: (b, 0)),
        compiler_params=cparams,
    )(xp, w1t, b1r, w2t, b2r)

    # Free metadata reshape: give the gate a broadcast-ready trailing axis.
    gate3 = gate.astype(x.dtype).reshape(b_pad, C, 1)

    # ---- phase 2: out = gate * x  (gate broadcast over L) --------------------
    out = pl.pallas_call(
        _apply_kernel,
        out_shape=jax.ShapeDtypeStruct((b_pad, C, L), x.dtype),
        grid=(n_blocks,),
        in_specs=[
            pl.BlockSpec((tb, C, L), lambda b: (b, 0, 0)),
            pl.BlockSpec((tb, C, 1), lambda b: (b, 0, 0)),
        ],
        out_specs=pl.BlockSpec((tb, C, L), lambda b: (b, 0, 0)),
        compiler_params=cparams,
    )(xp, gate3)

    return out if b_pad == B else out[:B]


def cablk_reference(x, w1, b1, w2, b2):
    # Pure-JAX reference mirroring the PyTorch forward.
    x32 = x.astype(jnp.float32)
    x_max = jnp.max(x32, axis=2, keepdims=True)          # (B, C, 1)
    x_avg = jnp.mean(x32, axis=2, keepdims=True)         # (B, C, 1)

    def mlp(p):                                           # p: (B, C, 1)
        h = jnp.einsum("hc,bcl->bhl", w1, p) + b1[None, :, :]
        h = jnp.maximum(h, 0.0)
        return jnp.einsum("ch,bhl->bcl", w2, h) + b2[None, :, :]

    gate = jax.nn.sigmoid(mlp(x_max) + mlp(x_avg))        # (B, C, 1)
    return (gate * x32).astype(x.dtype)


if __name__ == "__main__":
    # in_channel=12, ratio=3 -> hidden=4
    B, C, L = 2, 12, 16
    ratio = 3
    H = C // ratio

    key = jax.random.PRNGKey(0)
    kx, k1, k2, k3, k4, kx2 = jax.random.split(key, 6)

    x = jax.random.normal(kx, (B, C, L), dtype=jnp.float32)
    w1 = jax.random.normal(k1, (H, C), dtype=jnp.float32) * 0.3   # shared_mlp1.weight[:, :, 0]
    b1 = jax.random.normal(k2, (H, 1), dtype=jnp.float32) * 0.1   # shared_mlp1.bias
    w2 = jax.random.normal(k3, (C, H), dtype=jnp.float32) * 0.3   # shared_mlp2.weight[:, :, 0]
    b2 = jax.random.normal(k4, (C, 1), dtype=jnp.float32) * 0.1   # shared_mlp2.bias

    out = jax.block_until_ready(cablk_forward(x, w1, b1, w2, b2))
    ref = cablk_reference(x, w1, b1, w2, b2)
    assert out.shape == (B, C, L)
    assert jnp.allclose(out, ref, atol=1e-4, rtol=1e-4), "mismatch vs reference"

    # Second case: exercises multi-block grid + batch padding (B=20, TB=8 -> 3 blocks).
    B2 = 20
    x2 = jax.random.normal(kx2, (B2, C, L), dtype=jnp.float32)
    out2 = jax.block_until_ready(cablk_forward(x2, w1, b1, w2, b2, tb=8))
    ref2 = cablk_reference(x2, w1, b1, w2, b2)
    assert out2.shape == (B2, C, L)
    assert jnp.allclose(out2, ref2, atol=1e-4, rtol=1e-4), "mismatch vs reference (batched)"

    print("KERNEL_OK")
</pallas_src>

<mosaic_0001>
module attributes {stable_mosaic.version = 11 : i64} {
  func.func @_gate_kernel(%arg0: i32, %arg1: memref<8x12x16xf32, #tpu.memory_space<vmem>>, %arg2: memref<12x4xf32, #tpu.memory_space<vmem>>, %arg3: memref<1x4xf32, #tpu.memory_space<vmem>>, %arg4: memref<4x12xf32, #tpu.memory_space<vmem>>, %arg5: memref<1x12xf32, #tpu.memory_space<vmem>>, %arg6: memref<8x12xf32, #tpu.memory_space<vmem>>) attributes {dimension_semantics = [#tpu.dimension_semantics<parallel>], iteration_bounds = array<i64: 1>, scalar_prefetch = 0 : i64, scratch_operands = 0 : i64, tpu.core_type = #tpu.core_type<tc>, window_params = [{transform_indices = @transform_0, window_bounds = array<i64: 8, 12, 16>}, {pipeline_mode = #tpu.pipeline_mode<synchronous>, transform_indices = @transform_1, window_bounds = array<i64: 12, 4>}, {pipeline_mode = #tpu.pipeline_mode<synchronous>, transform_indices = @transform_2, window_bounds = array<i64: 1, 4>}, {pipeline_mode = #tpu.pipeline_mode<synchronous>, transform_indices = @transform_3, window_bounds = array<i64: 4, 12>}, {pipeline_mode = #tpu.pipeline_mode<synchronous>, transform_indices = @transform_4, window_bounds = array<i64: 1, 12>}, {transform_indices = @transform_5, window_bounds = array<i64: 8, 12>}]} {
    %c0 = arith.constant 0 : index
    %c0_0 = arith.constant 0 : index
    %c0_1 = arith.constant 0 : index
    %0 = vector.load %arg1[%c0, %c0_0, %c0_1] : memref<8x12x16xf32, #tpu.memory_space<vmem>>, vector<8x12x16xf32>
    %cst = arith.constant dense<0xFF800000> : vector<8x12xf32>
    %1 = vector.multi_reduction <maximumf>, %0, %cst [2] : vector<8x12x16xf32> to vector<8x12xf32>
    %cst_2 = arith.constant dense<0.000000e+00> : vector<8x12xf32>
    %2 = vector.multi_reduction <add>, %0, %cst_2 [2] : vector<8x12x16xf32> to vector<8x12xf32>
    %cst_3 = arith.constant 6.250000e-02 : f32
    %3 = vector.broadcast %cst_3 : f32 to vector<8x12xf32>
    %4 = arith.mulf %2, %3 : vector<8x12xf32>
    %5 = tpu.concatenate %1, %4 in 0 : vector<8x12xf32>, vector<8x12xf32> -> vector<16x12xf32>
    %c0_4 = arith.constant 0 : index
    %c0_5 = arith.constant 0 : index
    %6 = vector.load %arg2[%c0_4, %c0_5] : memref<12x4xf32, #tpu.memory_space<vmem>>, vector<12x4xf32>
    %cst_6 = arith.constant dense<0.000000e+00> : vector<16x4xf32>
    %7 = tpu.matmul %5, %6, %cst_6 {dimension_numbers = #tpu.dot_dimension_numbers<[1], [0], [0], [1], [0, 0, 1, 1], [], []>} : vector<16x12xf32>, vector<12x4xf32>, vector<16x4xf32> -> vector<16x4xf32>
    %c0_7 = arith.constant 0 : index
    %c0_8 = arith.constant 0 : index
    %8 = vector.load %arg3[%c0_7, %c0_8] : memref<1x4xf32, #tpu.memory_space<vmem>>, vector<1x4xf32>
    %9 = vector.broadcast %8 : vector<1x4xf32> to vector<16x4xf32>
    %10 = arith.addf %7, %9 : vector<16x4xf32>
    %cst_9 = arith.constant 0.000000e+00 : f32
    %11 = vector.broadcast %cst_9 : f32 to vector<16x4xf32>
    %12 = arith.maximumf %10, %11 : vector<16x4xf32>
    %c0_10 = arith.constant 0 : index
    %c0_11 = arith.constant 0 : index
    %13 = vector.load %arg4[%c0_10, %c0_11] : memref<4x12xf32, #tpu.memory_space<vmem>>, vector<4x12xf32>
    %cst_12 = arith.constant dense<0.000000e+00> : vector<16x12xf32>
    %14 = tpu.matmul %12, %13, %cst_12 {dimension_numbers = #tpu.dot_dimension_numbers<[1], [0], [0], [1], [0, 0, 1, 1], [], []>} : vector<16x4xf32>, vector<4x12xf32>, vector<16x12xf32> -> vector<16x12xf32>
    %c0_13 = arith.constant 0 : index
    %c0_14 = arith.constant 0 : index
    %15 = vector.load %arg5[%c0_13, %c0_14] : memref<1x12xf32, #tpu.memory_space<vmem>>, vector<1x12xf32>
    %16 = vector.broadcast %15 : vector<1x12xf32> to vector<16x12xf32>
    %17 = arith.addf %14, %16 : vector<16x12xf32>
    %18 = vector.extract_strided_slice %17 {offsets = [0, 0], sizes = [8, 12], strides = [1, 1]} : vector<16x12xf32> to vector<8x12xf32>
    %19 = vector.extract_strided_slice %17 {offsets = [8, 0], sizes = [8, 12], strides = [1, 1]} : vector<16x12xf32> to vector<8x12xf32>
    %20 = arith.addf %18, %19 : vector<8x12xf32>
    %21 = arith.negf %20 : vector<8x12xf32>
    %22 = math.exp %21 : vector<8x12xf32>
    %cst_15 = arith.constant 1.000000e+00 : f32
    %23 = vector.broadcast %cst_15 : f32 to vector<8x12xf32>
    %24 = arith.addf %23, %22 : vector<8x12xf32>
    %25 = arith.divf %23, %24 : vector<8x12xf32>
    %c0_16 = arith.constant 0 : index
    %c0_17 = arith.constant 0 : index
    %26 = vector.load %arg6[%c0_16, %c0_17] : memref<8x12xf32, #tpu.memory_space<vmem>>, vector<8x12xf32>
    tpu.vector_store %arg6[%c0_16, %c0_17], %25 {strides = array<i32>} : memref<8x12xf32, #tpu.memory_space<vmem>>, vector<8x12xf32>,
    return
  }
  func.func @transform_0(%arg0: i32) -> (i32, i32, i32) {
    %c0_i32 = arith.constant 0 : i32
    %c0_i32_0 = arith.constant 0 : i32
    %c0_i32_1 = arith.constant 0 : i32
    return %arg0, %c0_i32, %c0_i32_0 : i32, i32, i32
  }
  func.func @transform_1(%arg0: i32) -> (i32, i32) {
    %c0_i32 = arith.constant 0 : i32
    %c0_i32_0 = arith.constant 0 : i32
    %c0_i32_1 = arith.constant 0 : i32
    return %c0_i32, %c0_i32_0 : i32, i32
  }
  func.func @transform_2(%arg0: i32) -> (i32, i32) {
    %c0_i32 = arith.constant 0 : i32
    %c0_i32_0 = arith.constant 0 : i32
    %c0_i32_1 = arith.constant 0 : i32
    return %c0_i32, %c0_i32_0 : i32, i32
  }
  func.func @transform_3(%arg0: i32) -> (i32, i32) {
    %c0_i32 = arith.constant 0 : i32
    %c0_i32_0 = arith.constant 0 : i32
    %c0_i32_1 = arith.constant 0 : i32
    return %c0_i32, %c0_i32_0 : i32, i32
  }
  func.func @transform_4(%arg0: i32) -> (i32, i32) {
    %c0_i32 = arith.constant 0 : i32
    %c0_i32_0 = arith.constant 0 : i32
    %c0_i32_1 = arith.constant 0 : i32
    return %c0_i32, %c0_i32_0 : i32, i32
  }
  func.func @transform_5(%arg0: i32) -> (i32, i32) {
    %c0_i32 = arith.constant 0 : i32
    %c0_i32_0 = arith.constant 0 : i32
    return %arg0, %c0_i32 : i32, i32
  }
}

</mosaic_0001>

<bundles_post_ra>
// kernel: tpu_custom_call.1
= control target key start
LH: loop header
LB: loop body
LE: loop exit
PB: predicated region body
PF: predicated region fallthrough
CT: control target
= control target key end

     0   :  { %vm37_vm0 = vcmask 130048   ;;  %vm41_vm1 = vcmask 125952   ;;  %s861_s0 = inlined_call_operand.vmem [shape: f32[8,12,16], index: 0, kind: input, shape index: {}]   ;;  %s862_s1 = inlined_call_operand.vmem [shape: f32[12,4], index: 1, kind: input, shape index: {}]   ;;  %s863_s2 = inlined_call_operand.vmem [shape: f32[1,4], index: 2, kind: input, shape index: {}]   ;;  %s864_s3 = inlined_call_operand.vmem [shape: f32[4,12], index: 3, kind: input, shape index: {}]   ;;  %s865_s4 = inlined_call_operand.vmem [shape: f32[1,12], index: 4, kind: input, shape index: {}]   ;;  %s866_s5 = inlined_call_operand.hbm [shape: f32[8,12], index: 5, kind: output, shape index: {}]  }
   0x1   :  { %v23_v0 = vld [vmem:[%s861_s0 + $0x10] sm:$0xff]  ;;  %v21_v1 = vld [vmem:[%s861_s0] sm:$0xff]  ;;  %v24_v2 = vld [vmem:[%s861_s0 + $0x18] sm:$0xf] }
   0x2   :  { %v93_v3 = vsel %vm37_vm0, %v23_v0, 0.0  ;;  %v87_v4 = vsel %vm37_vm0, %v21_v1, 0.0  ;;  %v22_v5 = vld [vmem:[%s861_s0 + $0x8] sm:$0xf]  ;;  %v96_v6 = vsel %vm41_vm1, %v24_v2, 0.0  ;;  %v38_v9 = vsel %vm37_vm0, %v21_v1, -inf }
   0x3   :  { %94 = vadd.xlane.f32.xlu1 %v93_v3  ;;  %88 = vadd.xlane.f32.xlu0 %v87_v4  ;;  %v90_v7 = vsel %vm41_vm1, %v22_v5, 0.0  ;;  %v42_v8 = vsel %vm41_vm1, %v22_v5, -inf }
   0x7   :  { %97 = vadd.xlane.f32.xlu1 %v96_v6  ;;  %91 = vadd.xlane.f32.xlu0 %v90_v7 }
   0x8   :  { %10 = vsyncpa [#allocation3], 0  ;;  %v48_v10 = vsel %vm41_vm1, %v24_v2, -inf  ;;  %v45_v11 = vsel %vm37_vm0, %v23_v0, -inf  ;;  %v26_v12 = vld [vmem:[%s861_s0 + $0x28] sm:$0xf]  ;;  %v167_v3 = vlaneseq }
   0x9   :  { %v25_v13 = vld [vmem:[%s861_s0 + $0x20] sm:$0xff]  ;;  %v102_v14 = vsel %vm41_vm1, %v26_v12, 0.0  ;;  %v54_v16 = vsel %vm41_vm1, %v26_v12, -inf  ;;  %v28_v18 = vld [vmem:[%s861_s0 + $0x38] sm:$0xf]  ;;  %v27_v19 = vld [vmem:[%s861_s0 + $0x30] sm:$0xff] }
   0xa   :  { %v99_v15 = vsel %vm37_vm0, %v25_v13, 0.0  ;;  %v51_v17 = vsel %vm37_vm0, %v25_v13, -inf  ;;  %v108_v20 = vsel %vm41_vm1, %v28_v18, 0.0  ;;  %v105_v21 = vsel %vm37_vm0, %v27_v19, 0.0  ;;  %v30_v24 = vld [vmem:[%s861_s0 + $0x48] sm:$0xf] }
   0xb   :  { %43 = vmax.xlane.f32.xlu1 %v42_v8  ;;  %39 = vmax.xlane.f32.xlu0 %v38_v9  ;;  %v60_v22 = vsel %vm41_vm1, %v28_v18, -inf  ;;  %v57_v23 = vsel %vm37_vm0, %v27_v19, -inf  ;;  %v29_v25 = vld [vmem:[%s861_s0 + $0x40] sm:$0xff]  ;;  %v114_v26 = vsel %vm41_vm1, %v30_v24, 0.0  ;;  %v66_v28 = vsel %vm41_vm1, %v30_v24, -inf  ;;  %v31_v31 = vld [vmem:[%s861_s0 + $0x50] sm:$0xff] }
   0xc   :  { %v111_v27 = vsel %vm37_vm0, %v29_v25, 0.0  ;;  %v63_v29 = vsel %vm37_vm0, %v29_v25, -inf  ;;  %v32_v30 = vld [vmem:[%s861_s0 + $0x58] sm:$0xf]  ;;  %v117_v33 = vsel %vm37_vm0, %v31_v31, 0.0  ;;  %v69_v35 = vsel %vm37_vm0, %v31_v31, -inf }
   0xd   :  { %v120_v32 = vsel %vm41_vm1, %v32_v30, 0.0  ;;  %v72_v34 = vsel %vm41_vm1, %v32_v30, -inf  ;;  %v34_v36 = vld [vmem:[%s861_s0 + $0x68] sm:$0xf]  ;;  %v33_v37 = vld [vmem:[%s861_s0 + $0x60] sm:$0xff]  ;;  %v35_v43 = vld [vmem:[%s861_s0 + $0x70] sm:$0xff] }
   0xe   :  { %v126_v38 = vsel %vm41_vm1, %v34_v36, 0.0  ;;  %v123_v39 = vsel %vm37_vm0, %v33_v37, 0.0  ;;  %v78_v40 = vsel %vm41_vm1, %v34_v36, -inf  ;;  %v75_v41 = vsel %vm37_vm0, %v33_v37, -inf  ;;  %v36_v42 = vld [vmem:[%s861_s0 + $0x78] sm:$0xf] }
   0xf   :  { %49 = vmax.xlane.f32.xlu1 %v48_v10  ;;  %46 = vmax.xlane.f32.xlu0 %v45_v11  ;;  %v132_v44 = vsel %vm41_vm1, %v36_v42, 0.0  ;;  %v129_v45 = vsel %vm37_vm0, %v35_v43, 0.0  ;;  %v84_v46 = vsel %vm41_vm1, %v36_v42, -inf  ;;  %v81_v47 = vsel %vm37_vm0, %v35_v43, -inf  ;;  %v352_v48 = vld [vmem:[%s862_s1] sm:$0xff] }
  0x10   :  { %v353_v49 = vld [vmem:[%s862_s1 + $0x8] sm:$0xf]  ;;  %vm366_vm2 = vcmask 1043456   ;;  %vm626_vm3 = vmmov 1   ;;  %v168_v6 = vand.u32 127, %v167_v3  ;;  %v170_v10 = vshrl.u32 %v167_v3, 7 }
  0x11   :  { %v590_v50 = vpack.c.bf16 %v353_v49, %v352_v48  ;;  %vm591_vm4 = vmpackc.low %vm366_vm2, %vm626_vm3  ;;  %vm178_vm5 = vcmask 130112   ;;  %vm243_vm6 = vcmask 1041409   ;;  %vm245_vm7 = vcmask 1042434  }
  0x12   :  { %v173_v7 = vadd.s32 4294967288, %v168_v6  ;;  %vm247_vm8 = vcmask 1043459   ;;  %vm249_vm9 = vcmask 1044484   ;;  %vm251_vm10 = vcmask 1045509  }
  0x13   :  { %103 = vadd.xlane.f32.xlu1 %v102_v14  ;;  %100 = vadd.xlane.f32.xlu0 %v99_v15  ;;  %vm253_vm11 = vcmask 1046534   ;;  %vm255_vm12 = vcmask 1047559   ;;  %vm361_vm13 = vcmask 97280   ;;  %vm455_vm14 = vcmask 31744  }
  0x14   :  { %592 = vmatprep.subr.msk.bf16.mxu0 %vm591_vm4, %v590_v50  ;;  %v757_v11 = vsub.s32 %v173_v7, %v170_v10 }
  0x15   :  { %595 = vmatpush3.bf16.msk.msra.mxu0 %vm591_vm4, %v590_v50 }
  0x17   :  { %55 = vmax.xlane.f32.xlu1 %v54_v16  ;;  %52 = vmax.xlane.f32.xlu0 %v51_v17  ;;  %v759_v16 = vsub.s32 %v168_v6, %v170_v10 }
  0x1b   :  { %109 = vadd.xlane.f32.xlu1 %v108_v20  ;;  %106 = vadd.xlane.f32.xlu0 %v105_v21 }
  0x1f   :  { %61 = vmax.xlane.f32.xlu1 %v60_v22  ;;  %58 = vmax.xlane.f32.xlu0 %v57_v23 }
  0x23   :  { %115 = vadd.xlane.f32.xlu1 %v114_v26  ;;  %112 = vadd.xlane.f32.xlu0 %v111_v27 }
  0x27   :  { %67 = vmax.xlane.f32.xlu1 %v66_v28  ;;  %64 = vmax.xlane.f32.xlu0 %v63_v29 }
  0x2b   :  { %121 = vadd.xlane.f32.xlu1 %v120_v32  ;;  %118 = vadd.xlane.f32.xlu0 %v117_v33 }
  0x2f   :  { %73 = vmax.xlane.f32.xlu1 %v72_v34  ;;  %70 = vmax.xlane.f32.xlu0 %v69_v35 }
  0x33   :  { %127 = vadd.xlane.f32.xlu1 %v126_v38  ;;  %124 = vadd.xlane.f32.xlu0 %v123_v39 }
  0x37   :  { %79 = vmax.xlane.f32.xlu1 %v78_v40  ;;  %76 = vmax.xlane.f32.xlu0 %v75_v41 }
  0x3b   :  { %133 = vadd.xlane.f32.xlu1 %v132_v44  ;;  %130 = vadd.xlane.f32.xlu0 %v129_v45 }
  0x3f   :  { %85 = vmax.xlane.f32.xlu1 %v84_v46  ;;  %82 = vmax.xlane.f32.xlu0 %v81_v47 }
  0x90   :  { %v95_v51 = vpop.xlane.xlu1 %94  ;;  %v89_v52 = vpop.xlane.xlu0 %88 }
  0x91   :  { %v137_v17 = vmul.f32 0.0625, %v95_v51  ;;  %v135_v18 = vmul.f32 0.0625, %v89_v52 }
  0x93   :  { %v285_v27 = vrot.slane %v137_v17, %v759_v16  ;;  %v276_v28 = vrot.slane %v135_v18, %v759_v16 }
  0x94   :  { %v98_v53 = vpop.xlane.xlu1 %97  ;;  %v92_v54 = vpop.xlane.xlu0 %91 }
  0x95   :  { %v138_v12 = vmul.f32 0.0625, %v98_v53  ;;  %v136_v13 = vmul.f32 0.0625, %v92_v54 }
  0x97   :  { %v289_v19 = vrot.slane %v138_v12, %v757_v11  ;;  %v280_v20 = vrot.slane %v136_v13, %v757_v11 }
  0x98   :  { %v44_v55 = vpop.xlane.xlu1 %43  ;;  %v40_v56 = vpop.xlane.xlu0 %39 }
  0x99   :  { %v177_v31 = vrot.slane %v44_v55, %v757_v11  ;;  %v172_v32 = vrot.slane %v40_v56, %v759_v16  ;;  %v290_v33 = vsel %vm178_vm5, %v289_v19, %v285_v27  ;;  %v281_v34 = vsel %vm178_vm5, %v280_v20, %v276_v28 }
  0x9a   :  { %v345_v49 = vsel %vm243_vm6, %v290_v33, %v281_v34 }
  0x9b   :  { %v179_v46 = vsel %vm178_vm5, %v177_v31, %v172_v32 }
  0x9c   :  { %v50_v57 = vpop.xlane.xlu1 %49  ;;  %v47_v58 = vpop.xlane.xlu0 %46 }
  0x9d   :  { %v187_v21 = vrot.slane %v50_v57, %v757_v11  ;;  %v183_v22 = vrot.slane %v47_v58, %v759_v16 }
  0x9f   :  { %v188_v35 = vsel %vm178_vm5, %v187_v21, %v183_v22 }
  0xa0   :  { %v104_v59 = vpop.xlane.xlu1 %103  ;;  %v101_v60 = vpop.xlane.xlu0 %100  ;;  %v244_v50 = vsel %vm243_vm6, %v188_v35, %v179_v46 }
  0xa1   :  { %v140_v25 = vmul.f32 0.0625, %v104_v59  ;;  %v139_v26 = vmul.f32 0.0625, %v101_v60 }
  0xa3   :  { %v298_v38 = vrot.slane %v140_v25, %v757_v11  ;;  %v294_v39 = vrot.slane %v139_v26, %v759_v16 }
  0xa4   :  { %v745_v61 = vpop.xlane.xlu1 %55  ;;  %v747_v62 = vpop.xlane.xlu0 %52 }
  0xa5   :  { %v196_v40 = vrot.slane %v745_v61, %v757_v11  ;;  %v192_v41 = vrot.slane %v747_v62, %v759_v16  ;;  %v299_v55 = vsel %vm178_vm5, %v298_v38, %v294_v39  ;;  %v447_v39 = vld [vmem:[%s864_s3] sm:$0xf] }
  0xa6   :  { %585 = vmatprep.subr.msk.mxu1 %vm366_vm2, %v447_v39 }
  0xa7   :  { %v197_v56 = vsel %vm178_vm5, %v196_v40, %v192_v41  ;;  %586 = vmatpush3.msk.msra.mxu1 %vm366_vm2, %v447_v39  ;;  %v562_v40 = vld [vmem:[%s863_s2] ss:$0 sm:$0xff]  ;;  %s627_s2 = smov [#allocation2]  }
  0xa8   :  { %v110_v63 = vpop.xlane.xlu1 %109  ;;  %v107_v0 = vpop.xlane.xlu0 %106  ;;  %s554_s3 = sshll.u32 %s627_s2, 4  ;;  %s555_s3 = int_to_ptr.vmem [resolvable:$true] %s554_s3 }
  0xa9   :  { %v142_v29 = vmul.f32 0.0625, %v110_v63  ;;  %v141_v30 = vmul.f32 0.0625, %v107_v0  ;;  %s602_s8 = scalar_lea.vmem %s555_s3, 128  ;;  %p607_p1 = scmp.lt.s32.totalorder %s555_s3, %s555_s3 }
  0xaa   :  { %p603_p0 = scmp.ne.s32.totalorder %s555_s3, %s602_s8  ;;  %p608_p2 = scmp.lt.s32.totalorder %s602_s8, %s602_s8 }
  0xab   :  { %v307_v42 = vrot.slane %v142_v29, %v757_v11  ;;  %v303_v43 = vrot.slane %v141_v30, %v759_v16 }
  0xac   :  { %v749_v1 = vpop.xlane.xlu1 %61  ;;  %v751_v2 = vpop.xlane.xlu0 %58  ;;  %p609_p3 = por %p608_p2, %p607_p1 }
  0xad   :  { %v205_v44 = vrot.slane %v749_v1, %v757_v11  ;;  %v201_v45 = vrot.slane %v751_v2, %v759_v16  ;;  %v308_v59 = vsel %vm178_vm5, %v307_v42, %v303_v43 }
  0xae   :  { %p610_p4 = pnand %p609_p3, %p603_p0 }
  0xaf   :  { %v206_v60 = vsel %vm178_vm5, %v205_v44, %v201_v45 }
  0xb0   :  { %v116_v4 = vpop.xlane.xlu1 %115  ;;  %v113_v5 = vpop.xlane.xlu0 %112 }
  0xb1   :  { %v144_v47 = vmul.f32 0.0625, %v116_v4  ;;  %v143_v48 = vmul.f32 0.0625, %v113_v5 }
  0xb3   :  { %v316_v63 = vrot.slane %v144_v47, %v757_v11  ;;  %v312_v0 = vrot.slane %v143_v48, %v759_v16  ;;  %v566_v47 = vld [vmem:[%s865_s4] ss:$0 sm:$0xff] }
  0xb4   :  { %v753_v8 = vpop.xlane.xlu1 %67  ;;  %v755_v9 = vpop.xlane.xlu0 %64 }
  0xb5   :  { %v214_v61 = vrot.slane %v753_v8, %v757_v11  ;;  %v210_v62 = vrot.slane %v755_v9, %v759_v16  ;;  %v317_v18 = vsel %vm178_vm5, %v316_v63, %v312_v0 }
  0xb7   :  { %v215_v17 = vsel %vm178_vm5, %v214_v61, %v210_v62 }
  0xb8   :  { %v122_v14 = vpop.xlane.xlu1 %121  ;;  %v119_v15 = vpop.xlane.xlu0 %118 }
  0xb9   :  { %v146_v51 = vmul.f32 0.0625, %v122_v14  ;;  %v145_v52 = vmul.f32 0.0625, %v119_v15  ;;  %v346_v14 = vsel %vm245_vm7, %v299_v55, %v345_v49  ;;  %v246_v15 = vsel %vm245_vm7, %v197_v56, %v244_v50 }
  0xba   :  { %v347_v22 = vsel %vm247_vm8, %v308_v59, %v346_v14 }
  0xbb   :  { %v325_v3 = vrot.slane %v146_v51, %v757_v11  ;;  %v321_v4 = vrot.slane %v145_v52, %v759_v16  ;;  %v348_v32 = vsel %vm249_vm9, %v317_v18, %v347_v22 }
  0xbc   :  { %v765_v23 = vpop.xlane.xlu1 %73  ;;  %v767_v24 = vpop.xlane.xlu0 %70 }
  0xbd   :  { %v223_v1 = vrot.slane %v765_v23, %v757_v11  ;;  %v219_v2 = vrot.slane %v767_v24, %v759_v16  ;;  %v248_v23 = vsel %vm247_vm8, %v206_v60, %v246_v15  ;;  %v326_v24 = vsel %vm178_vm5, %v325_v3, %v321_v4 }
  0xbe   :  { %v250_v31 = vsel %vm249_vm9, %v215_v17, %v248_v23 }
  0xbf   :  { %v224_v19 = vsel %vm178_vm5, %v223_v1, %v219_v2 }
  0xc0   :  { %v128_v36 = vpop.xlane.xlu1 %127  ;;  %v125_v37 = vpop.xlane.xlu0 %124  ;;  %v252_v33 = vsel %vm251_vm10, %v224_v19, %v250_v31 }
  0xc1   :  { %v148_v57 = vmul.f32 0.0625, %v128_v36  ;;  %v147_v58 = vmul.f32 0.0625, %v125_v37  ;;  %v349_v37 = vsel %vm251_vm10, %v326_v24, %v348_v32 }
  0xc3   :  { %v334_v9 = vrot.slane %v148_v57, %v757_v11  ;;  %v330_v10 = vrot.slane %v147_v58, %v759_v16 }
  0xc4   :  { %v80_v53 = vpop.xlane.xlu1 %79  ;;  %v77_v54 = vpop.xlane.xlu0 %76 }
  0xc5   :  { %v232_v5 = vrot.slane %v80_v53, %v757_v11  ;;  %v228_v6 = vrot.slane %v77_v54, %v759_v16  ;;  %v335_v28 = vsel %vm178_vm5, %v334_v9, %v330_v10 }
  0xc7   :  { %v233_v27 = vsel %vm178_vm5, %v232_v5, %v228_v6 }
  0xc8   :  { %v134_v7 = vpop.xlane.xlu1 %133  ;;  %v131_v8 = vpop.xlane.xlu0 %130  ;;  %v254_v36 = vsel %vm253_vm11, %v233_v27, %v252_v33 }
  0xc9   :  { %v150_v12 = vmul.f32 0.0625, %v134_v7  ;;  %v149_v13 = vmul.f32 0.0625, %v131_v8 }
  0xcb   :  { %v343_v20 = vrot.slane %v150_v12, %v757_v11  ;;  %v339_v21 = vrot.slane %v149_v13, %v759_v16 }
  0xcc   :  { %v86_v25 = vpop.xlane.xlu1 %85  ;;  %v83_v26 = vpop.xlane.xlu0 %82 }
  0xcd   :  { %v241_v29 = vrot.slane %v86_v25, %v757_v11  ;;  %v237_v30 = vrot.slane %v83_v26, %v759_v16  ;;  %v344_v34 = vsel %vm178_vm5, %v343_v20, %v339_v21  ;;  %v350_v11 = vsel %vm253_vm11, %v335_v28, %v349_v37 }
  0xce   :  { %v351_v16 = vsel %vm255_vm12, %v344_v34, %v350_v11 }
  0xcf   :  { %v242_v35 = vsel %vm178_vm5, %v241_v29, %v237_v30 }
  0xd0   :  { %v256_v38 = vsel %vm255_vm12, %v242_v35, %v254_v36 }
  0xd1   :  { %582 = vmatprep.mubr.msk.f32.mxu0 %vm361_vm13, %v256_v38 }
  0xd2   :  { %583 = vmatmul.mubr.msk.f32.vlgmr.msra.gmra.mrb[0].mxu0 %vm361_vm13, %v351_v16 }
 0x1a5   :  { %v584_v41 = vpop.f32.mrb[0].mxu0 }
 0x1a6   :  { %v442_v42 = vadd.f32 %v584_v41, %v562_v40  ;;  %v436_v43 = vpop.f32.mrb[1].mxu0 }
 0x1a7   :  { %v437_v44 = vadd.f32 %v562_v40, %v436_v43 }
 0x1a8   :  { %v446_v46 = vmax.f32 %v442_v42, 0.0 }
 0x1a9   :  { %v445_v45 = vmax.f32 %v437_v44, 0.0 }
 0x1ab   :  { %587 = vmatprep.mubr.msk.f32.mxu1 %vm455_vm14, %v445_v45 }
 0x1ac   :  { %588 = vmatmul.mubr.msk.f32.vlgmr.msra.gmra.mrb[0].mxu1 %vm455_vm14, %v446_v46 }
 0x27f   :  { %v589_v48 = vpop.f32.mrb[0].mxu1 }
 0x280   :  { %v537_v49 = vadd.f32 %v589_v48, %v566_v47  ;;  %v531_v50 = vpop.f32.mrb[1].mxu1 }
 0x281   :  { %v532_v51 = vadd.f32 %v566_v47, %v531_v50 }
 0x283   :  { %v540_v52 = vadd.f32 %v537_v49, %v532_v51 }
 0x285   :  { %v570_v53 = vmul.f32 -1.442695, %v540_v52 }
 0x287   :  { %598 = vpow2.f32 %v570_v53 }
 0x291   :  { %v599_v54 = vpop.eup %598 }
 0x292   :  { %v544_v55 = vadd.f32 1.0, %v599_v54 }
 0x294   :  { %600 = vrcp.f32 %v544_v55 }
 0x29e   :  { %v601_v56 = vpop.eup %600 }
 0x29f   :  { %547 = vst.msk [vmem:[#allocation2] sm:$0xff] %vm361_vm13, %v601_v56 }
 0x2a0   :  { %613 = shalt.err (!%p610_p4)
}
 0x2a1   :  { %s614_s10 = scalar_lea.hbm %s866_s5, 128 }
 0x2a2   :  { %p615_p5 = scmp.ne.s32.totalorder %s866_s5, %s614_s10  ;;  %p618_p6 = scmp.lt.u32.totalorder %s614_s10, %s866_s5 }
 0x2a4   :  { %p620_p7 = pnand %p618_p6, %p615_p5 }
 0x2a6   :  { %623 = shalt.err (!%p620_p7)
}
 0x2a7   :  { %557 = dma.vmem_to_hbm [thread:$0]  %s555_s3, 128, %s866_s5, [#allocation3]  }
 0x2a8   :  { %624 = dma.done.wait [#allocation3], 128  }
 0x2a9   :  { %625 = vsyncadd [#allocation3], 4294967168 }
 0x2aa   :  { %561 = vsyncpa [#allocation3], 1 }

</bundles_post_ra>
